<compile_context>
chip_gen: v7x
topology: tpu7x:2x2x1
jax: 0.10.0
libtpu: 0.0.40
codegen_flags: <defaults>
</compile_context>

<pallas_src>
import functools

import jax
import jax.numpy as jnp
from jax import lax
from jax.experimental import pallas as pl
from jax.experimental.pallas import tpu as pltpu


def _round_up(a, b):
    return ((a + b - 1) // b) * b


def net3_kernel(x_ref,
                w1_ref, b1_ref,
                w2_ref, b2_ref,
                w3_ref, b3_ref,
                w4_ref, b4_ref,
                o_ref,
                *, chunk, n_chunks, unroll):
    # Tiny weights: load once per grid step (already bf16, cast in wrapper).
    w1 = w1_ref[...]
    w2 = w2_ref[...]
    w3 = w3_ref[...]
    w4 = w4_ref[...]
    # Hoist the [out,1] -> [out,chunk] bias broadcasts out of the chunk loop.
    b1 = jnp.broadcast_to(b1_ref[...], (w1.shape[0], chunk))
    b2 = jnp.broadcast_to(b2_ref[...], (w2.shape[0], chunk))
    b3 = jnp.broadcast_to(b3_ref[...], (w3.shape[0], chunk))
    b4 = jnp.broadcast_to(b4_ref[...], (w4.shape[0], chunk))

    def body(c, carry):
        start = pl.multiple_of(c * chunk, chunk)
        xc = x_ref[:, pl.ds(start, chunk)].astype(w1.dtype)
        # fc1: [10,2]@[2,c] -> fc2: [20,10]@[10,c] -> fc3: [10,20]@[20,c]
        h = jnp.dot(w1, xc, preferred_element_type=jnp.float32)
        h = jnp.maximum(h + b1, 0.0)
        h = jnp.dot(w2, h.astype(w2.dtype), preferred_element_type=jnp.float32)
        h = jnp.maximum(h + b2, 0.0)
        h = jnp.dot(w3, h.astype(w3.dtype), preferred_element_type=jnp.float32)
        h = jnp.maximum(h + b3, 0.0)
        # fc4 (no activation): [1,10]@[10,c]
        h = jnp.dot(w4, h.astype(w4.dtype), preferred_element_type=jnp.float32)
        o_ref[:, pl.ds(start, chunk)] = h + b4
        return carry

    lax.fori_loop(0, n_chunks, body, 0, unroll=unroll)


def net3_forward_feature_major(xt, params, *, tile_n=65536, chunk=512,
                               dot_dtype=jnp.bfloat16):
    """Feature-major entry point: xt [2, N] float32 -> [1, N] float32."""
    (w1, b1), (w2, b2), (w3, b3), (w4, b4) = params
    f_in, n = xt.shape
    assert f_in == 2, "Net_3.fc1 expects 2 input features"
    assert chunk % 128 == 0, "chunk must be lane-aligned (multiple of 128)"
    tile_n = _round_up(tile_n, chunk)

    # Effective tile: no larger than the (chunk-rounded) batch, and split into
    # >= 2 grid steps when possible so both v7x TensorCores get work.
    tile = _round_up(min(tile_n, _round_up(n, chunk)), chunk)
    n_pad = _round_up(n, tile)
    if n_pad // tile == 1 and tile >= 2 * chunk:
        tile = _round_up(tile // 2, chunk)
        n_pad = _round_up(n, tile)
    grid = (n_pad // tile,)
    n_chunks = tile // chunk

    xt = xt.astype(jnp.float32)
    if n_pad != n:
        xt = jnp.pad(xt, ((0, 0), (0, n_pad - n)))

    def batch_map(i):
        return (0, i)

    def const_map(i):   # same block every step -> weights stay VMEM-resident
        return (0, 0)

    param_specs, param_args = [], []
    for w, b in ((w1, b1), (w2, b2), (w3, b3), (w4, b4)):
        w = w.astype(dot_dtype)                      # MXU-native dtype for dots
        b = b.reshape(-1, 1).astype(jnp.float32)     # bias+ReLU stay f32 (VPU)
        param_specs += [pl.BlockSpec(w.shape, const_map),
                        pl.BlockSpec(b.shape, const_map)]
        param_args += [w, b]

    kernel = functools.partial(net3_kernel, chunk=chunk, n_chunks=n_chunks,
                               unroll=min(8, n_chunks))

    out = pl.pallas_call(
        kernel,
        out_shape=jax.ShapeDtypeStruct((1, n_pad), jnp.float32),
        grid=grid,
        in_specs=[pl.BlockSpec((f_in, tile), batch_map)] + param_specs,
        out_specs=pl.BlockSpec((1, tile), batch_map),
        compiler_params=pltpu.CompilerParams(
            dimension_semantics=("parallel",),
            vmem_limit_bytes=32 * 1024 * 1024),
        cost_estimate=pl.CostEstimate(flops=860 * n_pad,
                                      transcendentals=0,
                                      bytes_accessed=12 * n_pad),
    )(xt, *param_args)

    return out[:, :n]


def net3_forward(x, params, *, tile_n=65536, chunk=512, dot_dtype=jnp.bfloat16):
    """PyTorch-compatible entry: x [N, 2] -> [N, 1].

    The transpose to feature-major costs one extra HBM pass; if the producer
    can emit a [2, N] array, call net3_forward_feature_major() directly.
    """
    n, f_in = x.shape
    assert f_in == 2, "Net_3.fc1 expects 2 input features"
    out = net3_forward_feature_major(x.T, params, tile_n=tile_n, chunk=chunk,
                                     dot_dtype=dot_dtype)
    return out.T  # [N, 1]


def init_linear(key, in_features, out_features):
    """Deterministic init mimicking torch.nn.Linear: U(-1/sqrt(in), 1/sqrt(in))."""
    kw, kb = jax.random.split(key)
    bound = 1.0 / jnp.sqrt(jnp.float32(in_features))
    w = jax.random.uniform(kw, (out_features, in_features), jnp.float32,
                           minval=-bound, maxval=bound)
    b = jax.random.uniform(kb, (out_features, 1), jnp.float32,
                           minval=-bound, maxval=bound)
    return w, b


def reference_forward(x, params):
    (w1, b1), (w2, b2), (w3, b3), (w4, b4) = params
    h = jnp.maximum(x @ w1.T + b1.reshape(1, -1), 0.0)
    h = jnp.maximum(h @ w2.T + b2.reshape(1, -1), 0.0)
    h = jnp.maximum(h @ w3.T + b3.reshape(1, -1), 0.0)
    return h @ w4.T + b4.reshape(1, -1)


if __name__ == "__main__":
    key = jax.random.PRNGKey(0)
    k_x, k1, k2, k3, k4 = jax.random.split(key, 5)

    batch = 300  # not a multiple of the tile/chunk: exercises padding
    x = jax.random.normal(k_x, (batch, 2), jnp.float32)

    params = (
        init_linear(k1, 2, 10),
        init_linear(k2, 10, 20),
        init_linear(k3, 20, 10),
        init_linear(k4, 10, 1),
    )

    # Small tile/chunk here so the demo batch exercises a 2-step grid and a
    # 2-iteration in-kernel chunk loop; production batches should use the
    # defaults (tile_n=65536, chunk=512).
    out = net3_forward(x, params, tile_n=256, chunk=128)
    out = jax.block_until_ready(out)

    ref = reference_forward(x, params)
    assert out.shape == (batch, 1)
    # bf16 MXU dots (f32 accumulate) -> loose tolerance vs the pure-f32 reference.
    assert jnp.allclose(out, ref, atol=5e-2, rtol=5e-2), \
        float(jnp.max(jnp.abs(out - ref)))

    print("KERNEL_OK")
</pallas_src>

<mosaic_0001>
module attributes {stable_mosaic.version = 11 : i64} {
  func.func @net3_kernel(%arg0: i32, %arg1: memref<2x256xf32, #tpu.memory_space<vmem>>, %arg2: memref<10x2xbf16, #tpu.memory_space<vmem>>, %arg3: memref<10x1xf32, #tpu.memory_space<vmem>>, %arg4: memref<20x10xbf16, #tpu.memory_space<vmem>>, %arg5: memref<20x1xf32, #tpu.memory_space<vmem>>, %arg6: memref<10x20xbf16, #tpu.memory_space<vmem>>, %arg7: memref<10x1xf32, #tpu.memory_space<vmem>>, %arg8: memref<1x10xbf16, #tpu.memory_space<vmem>>, %arg9: memref<1x1xf32, #tpu.memory_space<vmem>>, %arg10: memref<1x256xf32, #tpu.memory_space<vmem>>) attributes {dimension_semantics = [#tpu.dimension_semantics<parallel>], iteration_bounds = array<i64: 2>, scalar_prefetch = 0 : i64, scratch_operands = 0 : i64, tpu.core_type = #tpu.core_type<tc>, window_params = [{transform_indices = @transform_0, window_bounds = array<i64: 2, 256>}, {pipeline_mode = #tpu.pipeline_mode<synchronous>, transform_indices = @transform_1, window_bounds = array<i64: 10, 2>}, {pipeline_mode = #tpu.pipeline_mode<synchronous>, transform_indices = @transform_2, window_bounds = array<i64: 10, 1>}, {pipeline_mode = #tpu.pipeline_mode<synchronous>, transform_indices = @transform_3, window_bounds = array<i64: 20, 10>}, {pipeline_mode = #tpu.pipeline_mode<synchronous>, transform_indices = @transform_4, window_bounds = array<i64: 20, 1>}, {pipeline_mode = #tpu.pipeline_mode<synchronous>, transform_indices = @transform_5, window_bounds = array<i64: 10, 20>}, {pipeline_mode = #tpu.pipeline_mode<synchronous>, transform_indices = @transform_6, window_bounds = array<i64: 10, 1>}, {pipeline_mode = #tpu.pipeline_mode<synchronous>, transform_indices = @transform_7, window_bounds = array<i64: 1, 10>}, {pipeline_mode = #tpu.pipeline_mode<synchronous>, transform_indices = @transform_8, window_bounds = array<i64: 1, 1>}, {transform_indices = @transform_9, window_bounds = array<i64: 1, 256>}]} {
    %c0 = arith.constant 0 : index
    %c0_0 = arith.constant 0 : index
    %0 = vector.load %arg2[%c0, %c0_0] : memref<10x2xbf16, #tpu.memory_space<vmem>>, vector<10x2xbf16>
    %c0_1 = arith.constant 0 : index
    %c0_2 = arith.constant 0 : index
    %1 = vector.load %arg4[%c0_1, %c0_2] : memref<20x10xbf16, #tpu.memory_space<vmem>>, vector<20x10xbf16>
    %c0_3 = arith.constant 0 : index
    %c0_4 = arith.constant 0 : index
    %2 = vector.load %arg6[%c0_3, %c0_4] : memref<10x20xbf16, #tpu.memory_space<vmem>>, vector<10x20xbf16>
    %c0_5 = arith.constant 0 : index
    %c0_6 = arith.constant 0 : index
    %3 = vector.load %arg8[%c0_5, %c0_6] : memref<1x10xbf16, #tpu.memory_space<vmem>>, vector<1x10xbf16>
    %c0_7 = arith.constant 0 : index
    %c0_8 = arith.constant 0 : index
    %4 = vector.load %arg3[%c0_7, %c0_8] : memref<10x1xf32, #tpu.memory_space<vmem>>, vector<10x1xf32>
    %5 = vector.shape_cast %4 : vector<10x1xf32> to vector<10x1xf32>
    %6 = vector.broadcast %5 : vector<10x1xf32> to vector<10x128xf32>
    %c0_9 = arith.constant 0 : index
    %c0_10 = arith.constant 0 : index
    %7 = vector.load %arg5[%c0_9, %c0_10] : memref<20x1xf32, #tpu.memory_space<vmem>>, vector<20x1xf32>
    %8 = vector.shape_cast %7 : vector<20x1xf32> to vector<20x1xf32>
    %9 = vector.broadcast %8 : vector<20x1xf32> to vector<20x128xf32>
    %c0_11 = arith.constant 0 : index
    %c0_12 = arith.constant 0 : index
    %10 = vector.load %arg7[%c0_11, %c0_12] : memref<10x1xf32, #tpu.memory_space<vmem>>, vector<10x1xf32>
    %11 = vector.shape_cast %10 : vector<10x1xf32> to vector<10x1xf32>
    %12 = vector.broadcast %11 : vector<10x1xf32> to vector<10x128xf32>
    %c0_13 = arith.constant 0 : index
    %c0_14 = arith.constant 0 : index
    %13 = vector.load %arg9[%c0_13, %c0_14] : memref<1x1xf32, #tpu.memory_space<vmem>>, vector<1x1xf32>
    %14 = vector.shape_cast %13 : vector<1x1xf32> to vector<1x1xf32>
    %15 = vector.broadcast %14 : vector<1x1xf32> to vector<1x128xf32>
    %c0_i32 = arith.constant 0 : i32
    %c128_i32 = arith.constant 128 : i32
    %16 = arith.muli %c0_i32, %c128_i32 : i32
    %17 = tpu.assume_multiple %16, 128 : i32
    %c0_15 = arith.constant 0 : index
    %18 = arith.index_cast %17 : i32 to index
    %19 = vector.load %arg1[%c0_15, %18] : memref<2x256xf32, #tpu.memory_space<vmem>>, vector<2x128xf32>
    %20 = arith.truncf %19 : vector<2x128xf32> to vector<2x128xbf16>
    %cst = arith.constant dense<0.000000e+00> : vector<10x128xf32>
    %21 = tpu.matmul %0, %20, %cst {dimension_numbers = #tpu.dot_dimension_numbers<[1], [0], [0], [1], [0, 0, 1, 1], [], []>} : vector<10x2xbf16>, vector<2x128xbf16>, vector<10x128xf32> -> vector<10x128xf32>
    %22 = arith.addf %21, %6 : vector<10x128xf32>
    %cst_16 = arith.constant 0.000000e+00 : f32
    %23 = vector.broadcast %cst_16 : f32 to vector<10x128xf32>
    %24 = arith.maximumf %22, %23 : vector<10x128xf32>
    %25 = arith.truncf %24 : vector<10x128xf32> to vector<10x128xbf16>
    %cst_17 = arith.constant dense<0.000000e+00> : vector<20x128xf32>
    %26 = tpu.matmul %1, %25, %cst_17 {dimension_numbers = #tpu.dot_dimension_numbers<[1], [0], [0], [1], [0, 0, 1, 1], [], []>} : vector<20x10xbf16>, vector<10x128xbf16>, vector<20x128xf32> -> vector<20x128xf32>
    %27 = arith.addf %26, %9 : vector<20x128xf32>
    %cst_18 = arith.constant 0.000000e+00 : f32
    %28 = vector.broadcast %cst_18 : f32 to vector<20x128xf32>
    %29 = arith.maximumf %27, %28 : vector<20x128xf32>
    %30 = arith.truncf %29 : vector<20x128xf32> to vector<20x128xbf16>
    %cst_19 = arith.constant dense<0.000000e+00> : vector<10x128xf32>
    %31 = tpu.matmul %2, %30, %cst_19 {dimension_numbers = #tpu.dot_dimension_numbers<[1], [0], [0], [1], [0, 0, 1, 1], [], []>} : vector<10x20xbf16>, vector<20x128xbf16>, vector<10x128xf32> -> vector<10x128xf32>
    %32 = arith.addf %31, %12 : vector<10x128xf32>
    %cst_20 = arith.constant 0.000000e+00 : f32
    %33 = vector.broadcast %cst_20 : f32 to vector<10x128xf32>
    %34 = arith.maximumf %32, %33 : vector<10x128xf32>
    %35 = arith.truncf %34 : vector<10x128xf32> to vector<10x128xbf16>
    %cst_21 = arith.constant dense<0.000000e+00> : vector<1x128xf32>
    %36 = tpu.matmul %3, %35, %cst_21 {dimension_numbers = #tpu.dot_dimension_numbers<[1], [0], [0], [1], [0, 0, 1, 1], [], []>} : vector<1x10xbf16>, vector<10x128xbf16>, vector<1x128xf32> -> vector<1x128xf32>
    %37 = arith.addf %36, %15 : vector<1x128xf32>
    %c0_22 = arith.constant 0 : index
    %38 = arith.index_cast %17 : i32 to index
    %39 = vector.load %arg10[%c0_22, %38] : memref<1x256xf32, #tpu.memory_space<vmem>>, vector<1x128xf32>
    tpu.vector_store %arg10[%c0_22, %38], %37 {strides = array<i32>} : memref<1x256xf32, #tpu.memory_space<vmem>>, vector<1x128xf32>,
    %c1_i32 = arith.constant 1 : i32
    %c128_i32_23 = arith.constant 128 : i32
    %40 = arith.muli %c1_i32, %c128_i32_23 : i32
    %41 = tpu.assume_multiple %40, 128 : i32
    %c0_24 = arith.constant 0 : index
    %42 = arith.index_cast %41 : i32 to index
    %43 = vector.load %arg1[%c0_24, %42] : memref<2x256xf32, #tpu.memory_space<vmem>>, vector<2x128xf32>
    %44 = arith.truncf %43 : vector<2x128xf32> to vector<2x128xbf16>
    %cst_25 = arith.constant dense<0.000000e+00> : vector<10x128xf32>
    %45 = tpu.matmul %0, %44, %cst_25 {dimension_numbers = #tpu.dot_dimension_numbers<[1], [0], [0], [1], [0, 0, 1, 1], [], []>} : vector<10x2xbf16>, vector<2x128xbf16>, vector<10x128xf32> -> vector<10x128xf32>
    %46 = arith.addf %45, %6 : vector<10x128xf32>
    %cst_26 = arith.constant 0.000000e+00 : f32
    %47 = vector.broadcast %cst_26 : f32 to vector<10x128xf32>
    %48 = arith.maximumf %46, %47 : vector<10x128xf32>
    %49 = arith.truncf %48 : vector<10x128xf32> to vector<10x128xbf16>
    %cst_27 = arith.constant dense<0.000000e+00> : vector<20x128xf32>
    %50 = tpu.matmul %1, %49, %cst_27 {dimension_numbers = #tpu.dot_dimension_numbers<[1], [0], [0], [1], [0, 0, 1, 1], [], []>} : vector<20x10xbf16>, vector<10x128xbf16>, vector<20x128xf32> -> vector<20x128xf32>
    %51 = arith.addf %50, %9 : vector<20x128xf32>
    %cst_28 = arith.constant 0.000000e+00 : f32
    %52 = vector.broadcast %cst_28 : f32 to vector<20x128xf32>
    %53 = arith.maximumf %51, %52 : vector<20x128xf32>
    %54 = arith.truncf %53 : vector<20x128xf32> to vector<20x128xbf16>
    %cst_29 = arith.constant dense<0.000000e+00> : vector<10x128xf32>
    %55 = tpu.matmul %2, %54, %cst_29 {dimension_numbers = #tpu.dot_dimension_numbers<[1], [0], [0], [1], [0, 0, 1, 1], [], []>} : vector<10x20xbf16>, vector<20x128xbf16>, vector<10x128xf32> -> vector<10x128xf32>
    %56 = arith.addf %55, %12 : vector<10x128xf32>
    %cst_30 = arith.constant 0.000000e+00 : f32
    %57 = vector.broadcast %cst_30 : f32 to vector<10x128xf32>
    %58 = arith.maximumf %56, %57 : vector<10x128xf32>
    %59 = arith.truncf %58 : vector<10x128xf32> to vector<10x128xbf16>
    %cst_31 = arith.constant dense<0.000000e+00> : vector<1x128xf32>
    %60 = tpu.matmul %3, %59, %cst_31 {dimension_numbers = #tpu.dot_dimension_numbers<[1], [0], [0], [1], [0, 0, 1, 1], [], []>} : vector<1x10xbf16>, vector<10x128xbf16>, vector<1x128xf32> -> vector<1x128xf32>
    %61 = arith.addf %60, %15 : vector<1x128xf32>
    %c0_32 = arith.constant 0 : index
    %62 = arith.index_cast %41 : i32 to index
    %63 = vector.load %arg10[%c0_32, %62] : memref<1x256xf32, #tpu.memory_space<vmem>>, vector<1x128xf32>
    tpu.vector_store %arg10[%c0_32, %62], %61 {strides = array<i32>} : memref<1x256xf32, #tpu.memory_space<vmem>>, vector<1x128xf32>,
    %c2_i32 = arith.constant 2 : i32
    return
  }
  func.func @transform_0(%arg0: i32) -> (i32, i32) {
    %c0_i32 = arith.constant 0 : i32
    %c0_i32_0 = arith.constant 0 : i32
    return %c0_i32, %arg0 : i32, i32
  }
  func.func @transform_1(%arg0: i32) -> (i32, i32) {
    %c0_i32 = arith.constant 0 : i32
    %c0_i32_0 = arith.constant 0 : i32
    %c0_i32_1 = arith.constant 0 : i32
    return %c0_i32, %c0_i32_0 : i32, i32
  }
  func.func @transform_2(%arg0: i32) -> (i32, i32) {
    %c0_i32 = arith.constant 0 : i32
    %c0_i32_0 = arith.constant 0 : i32
    %c0_i32_1 = arith.constant 0 : i32
    return %c0_i32, %c0_i32_0 : i32, i32
  }
  func.func @transform_3(%arg0: i32) -> (i32, i32) {
    %c0_i32 = arith.constant 0 : i32
    %c0_i32_0 = arith.constant 0 : i32
    %c0_i32_1 = arith.constant 0 : i32
    return %c0_i32, %c0_i32_0 : i32, i32
  }
  func.func @transform_4(%arg0: i32) -> (i32, i32) {
    %c0_i32 = arith.constant 0 : i32
    %c0_i32_0 = arith.constant 0 : i32
    %c0_i32_1 = arith.constant 0 : i32
    return %c0_i32, %c0_i32_0 : i32, i32
  }
  func.func @transform_5(%arg0: i32) -> (i32, i32) {
    %c0_i32 = arith.constant 0 : i32
    %c0_i32_0 = arith.constant 0 : i32
    %c0_i32_1 = arith.constant 0 : i32
    return %c0_i32, %c0_i32_0 : i32, i32
  }
  func.func @transform_6(%arg0: i32) -> (i32, i32) {
    %c0_i32 = arith.constant 0 : i32
    %c0_i32_0 = arith.constant 0 : i32
    %c0_i32_1 = arith.constant 0 : i32
    return %c0_i32, %c0_i32_0 : i32, i32
  }
  func.func @transform_7(%arg0: i32) -> (i32, i32) {
    %c0_i32 = arith.constant 0 : i32
    %c0_i32_0 = arith.constant 0 : i32
    %c0_i32_1 = arith.constant 0 : i32
    return %c0_i32, %c0_i32_0 : i32, i32
  }
  func.func @transform_8(%arg0: i32) -> (i32, i32) {
    %c0_i32 = arith.constant 0 : i32
    %c0_i32_0 = arith.constant 0 : i32
    %c0_i32_1 = arith.constant 0 : i32
    return %c0_i32, %c0_i32_0 : i32, i32
  }
  func.func @transform_9(%arg0: i32) -> (i32, i32) {
    %c0_i32 = arith.constant 0 : i32
    %c0_i32_0 = arith.constant 0 : i32
    return %c0_i32, %arg0 : i32, i32
  }
}

</mosaic_0001>

<bundles_post_ra>
// kernel: tpu_custom_call.1
= control target key start
LH: loop header
LB: loop body
LE: loop exit
PB: predicated region body
PF: predicated region fallthrough
CT: control target
= control target key end

     0   :  { %s1409_s0 = inlined_call_operand.vmem [shape: f32[2,512], index: 0, kind: input, shape index: {}]   ;;  %s1410_s1 = inlined_call_operand.vmem [shape: bf16[10,2], index: 1, kind: input, shape index: {}]   ;;  %s1411_s2 = inlined_call_operand.vmem [shape: f32[10,1], index: 2, kind: input, shape index: {}]   ;;  %s1412_s3 = inlined_call_operand.vmem [shape: bf16[20,10], index: 3, kind: input, shape index: {}]   ;;  %s1413_s4 = inlined_call_operand.vmem [shape: f32[20,1], index: 4, kind: input, shape index: {}]   ;;  %s1414_s5 = inlined_call_operand.vmem [shape: bf16[10,20], index: 5, kind: input, shape index: {}]   ;;  %s1415_s6 = inlined_call_operand.vmem [shape: f32[10,1], index: 6, kind: input, shape index: {}]   ;;  %s1416_s7 = inlined_call_operand.vmem [shape: bf16[1,10], index: 7, kind: input, shape index: {}]   ;;  %s1417_s8 = inlined_call_operand.<no memory space> [shape: f32[1,1], index: 8, kind: input, shape index: {}]   ;;  %s1418_s9 = inlined_call_operand.hbm [shape: f32[1,512], index: 9, kind: output, shape index: {}]  }
   0x1   :  { %v14_v0 = vstv %s1417_s8 }
   0x2   :  { %15 = vst [vmem:[#allocation2] sm:$0x1] %v14_v0 }
   0x3   :  { %16 = vsyncpa [#allocation4], 0 }
   0x4   :  { %18 = vsyncpa [#allocation4 + $0x1], 0  ;;  %s1180_s11 = smov 0   ;;  %s1182_s12 = smov 0  }
   0x5   :  { %s1184_s13 = smov 0   ;;  %s1186_s14 = smov 0  }
   0x6 LB: > { %s1201_s8 = sadd.s32 4294967295, %s1121_s14   ;;  %s908_s15 = sadd.s32 4294967294, %s1121_s14   ;;  %s1121_s14 = sphi %s1186_s14, %s1426_s14   ;;  %s1117_s13 = sphi %s1184_s13, %s1425_s13   ;;  %s1113_s12 = sphi %s1182_s12, %s1424_s12   ;;  %s1109_s11 = sphi %s1180_s11, %s1423_s11  }
   0x7   : > { %s1205_s16 = sadd.s32 1, %s1121_s14   ;;  %s225_s17 = sadd.s32 1, %s1117_s13 }
   0x8   : > { %s222_s18 = ssub.s32 %s1121_s14, %s1205_s16  ;;  %p235_p0 = scmp.ne.s32.totalorder %s1117_s13, %s1113_s12 }
   0x9   : > { %p223_p1 = scmp.eq.s32.totalorder %s222_s18, 0  ;;  %p236_p2 = scmp.eq.s32.totalorder %s1201_s8, 1 }
   0xa   : > { %p241_p3 = scmp.ne.s32.totalorder %s1113_s12, %s1109_s11  ;;  %p242_p4 = scmp.eq.s32.totalorder %s908_s15, 1 }
   0xb   : > { %s1216_s19 = scalar_select %p223_p1, %s1117_s13, %s225_s17  }
   0xc   : > { %p1218_p5 = por %p236_p2, %p235_p0  ;;  %p1222_p6 = por %p242_p4, %p241_p3 }
   0xd   : > { %p911_p7 = scmp.ge.s32.totalorder %s1121_s14, 1  ;;  %p293_p8 = scmp.lt.s32.totalorder %s1121_s14, 3 }
   0xf   : > { %p294_p9 = pnand %p911_p7, %p293_p8 }
  0x10   : > { %s913_s22 = sshll.u32 (!%p294_p9), %s1201_s8, 1  ;;  %v1123_v1 = vmov (!%p294_p9), 0.0   ;;  %vm1124_vm0 = vmmov (!%p294_p9), 0   ;;  %v345_v2 = vld [vmem:[%s1411_s2] sm:$0xff] (!%p294_p9)  ;;  %v1125_v3 = vmov (!%p294_p9), 0   ;;  %vm408_vm1 = vcmask (!%p294_p9), 1040384  }
  0x11   : > { %297 = sbr.rel (%p294_p9) target bundleno = 1398 (0x576), region = 56  ;;  %957 = vmatprep.subr.bf16.mxu0 (!%p294_p9), %v1123_v1  ;;  %p330_p10 = scmp.lt.s32.totalorder (!%p294_p9), %s913_s22, 3  ;;  %959 = vmatprep.mubr.msk.bf16.mxu0 (!%p294_p9), %vm1124_vm0, %v1123_v1  ;;  %v346_v4 = vld [vmem:[%s1411_s2 + $0x8] sm:$0x3] (!%p294_p9)  ;;  %v359_v9 = vld [vmem:[%s1413_s4 + $0x10] sm:$0xf] (!%p294_p9) }
  0x12   : > { %1053 = vset.pattern.permute.xlu0 (!%p294_p9), %v1125_v3  ;;  %1054 = vset.pattern.permute.xlu1 (!%p294_p9), %v1125_v3  ;;  %v1249_v12 = vld [vmem:[%s1410_s1] sm:$0x1f] (!%p294_p9)   ;;  %vm404_vm2 = vcmask (!%p294_p9), 15360   ;;  %v376_v13 = vld [vmem:[%s1415_s6 + $0x8] sm:$0x3] (!%p294_p9)  ;;  %vm464_vm3 = vcmask (!%p294_p9), 80896  }
  0x13   : > { %349 = vperm.xlu0 (!%p294_p9), %1053, %v345_v2   ;;  %v1262_v14 = vld [vmem:[%s1412_s3] sm:$0xff] (!%p294_p9)   ;;  %v358_v16 = vld [vmem:[%s1413_s4 + $0x8] sm:$0xff] (!%p294_p9)  ;;  %vm471_vm4 = vcmask (!%p294_p9), 1044480   ;;  %vm537_vm5 = vcmask (!%p294_p9), 1041408   ;;  %vm533_vm6 = vcmask (!%p294_p9), 162816   ;;  %s936_s28 = sshll.u32 (!%p294_p9), %s1201_s8, 5 }
  0x14   : > { %965 = vmatprep.mubr.msk.bf16.mxu1 (!%p294_p9), %vm464_vm3, %v1262_v14  ;;  %v357_v15 = vld [vmem:[%s1413_s4] sm:$0xff] (!%p294_p9)  ;;  %v1280_v31 = vld [vmem:[%s1412_s3 + $0x8] ss:$0 sps:$4 sm:$0x33] (!%p294_p9)   ;;  %s1362_s15 = scalar_lea.hbm (!%p294_p9), %s1418_s9, %s936_s28  ;;  %s1126_s18 = smov (!%p294_p9), [#allocation3]  }
  0x15   : > { %362 = vperm.xlu1 (!%p294_p9), %1054, %v357_v15   ;;  %v375_v17 = vld [vmem:[%s1415_s6] sm:$0xff] (!%p294_p9) }
  0x16   : > { %v387_v18 = vld [vmem:[#allocation2] sm:$0x1] (!%p294_p9) }
  0x17   : > { %354 = vperm.xlu0 (!%p294_p9), %1053, %v346_v4   ;;  %v1301_v48 = vld [vmem:[%s1414_s5] sm:$0x1f] (!%p294_p9)  }
  0x18   : > { %s1428_s22 = smov (!%p330_p10, %s913_s22), 3  ;;  %v344_v2 = vld [vmem:[%s1416_s7] sm:$0x1] }
  0x19   : > { %s914_s25 = sshll.u32 %s1428_s22, 1  ;;  %367 = vperm.xlu1 %1054, %v358_v16   ;;  %s1063_s22 = sshll.u32 %s1126_s18, 4  ;;  %s1064_s22 = int_to_ptr.vmem [resolvable:$false] %s1063_s22 }
  0x1a   : > { %s333_s30 = scalar_lea.vmem %s1409_s0, %s914_s25  ;;  %s326_s25 = sand.u32 1, %s1113_s12  }
  0x1b   : > { %v397_v5 = vld [vmem:[%s333_s30] sm:$0x3]  ;;  %v924_v6 = vld [vmem:[%s333_s30 + $0x2] sm:$0x3]  ;;  %372 = vperm.xlu0 %1053, %v359_v9   ;;  %v393_v9 = vlaneseq  ;;  %s912_s26 = sshll.u32 %s326_s25, 1  ;;  %s835_s8 = scalar_lea.sflag [#allocation4], %s326_s25 }
  0x1c   : > { %v398_v7 = vpack.c.bf16 %v397_v5, %v397_v5  ;;  %v638_v8 = vpack.c.bf16 %v924_v6, %v924_v6  ;;  %s1341_s27 = scalar_lea.vmem [#allocation3], %s912_s26  ;;  %s1065_s23 = scalar_lea.vmem %s1064_s22, 64 }
  0x1d   : > { %379 = vperm.xlu1 %1054, %v375_v17   ;;  %vm1337_vm7 = vcmp.lt.s32.totalorder %v393_v9, 128  ;;  %s849_s29 = sshll.u32 %s1341_s27, 4  ;;  %s1364_s29 = int_to_ptr.vmem [resolvable:$true] %s849_s29 }
  0x1e   : > { %v410_v10 = vsel %vm408_vm1, %v398_v7, 0  ;;  %v1244_v11 = vsel %vm408_vm1, %v638_v8, 0  ;;  %s1059_s17 = scalar_lea.vmem %s1364_s29, 32  ;;  %p1066_p0 = scmp.lt.s32.totalorder %s1364_s29, %s1064_s22 }
  0x1f   : > { %958 = vmatpush3.bf16.msra.mxu0 %v410_v10  ;;  %384 = vperm.xlu0 %1053, %v376_v13   ;;  %v394_v10 = vshrl.u32 %v393_v9, 7  ;;  %p1060_p11 = scmp.ne.s32.totalorder %s1364_s29, %s1059_s17  ;;  %p1067_p1 = scmp.lt.s32.totalorder %s1065_s23, %s1059_s17 }
  0x20   : > { %969 = vmatprep.subr.bf16.mxu0 %v1123_v1 }
  0x21   : > { %390 = vperm.xlu1 %1054, %v387_v18   ;;  %p1061_p12 = pnand %p1060_p11, %p1218_p5  ;;  %p1068_p2 = por %p1067_p1, %p1066_p0 }
  0x22   : > { %960 = vmatmul.mubr.msk.bf16.vlgmr.msra.gmra.mrb[0].mxu0 %vm404_vm2, %v1249_v12 }
  0x23   : > { %973 = vmatprep.mubr.msk.bf16.mxu0 %vm1124_vm0, %v1123_v1  ;;  %p1062_p13 = pneg %p1061_p12 }
  0x25   : > { %p1069_p3 = pnand %p1068_p2, %p1062_p13 }
  0x92   : > { %v350_v19 = vpop.permute.xlu0 %349 }
  0x94   : > { %v1287_v32 = vpop.permute.xlu1 %362 }
  0x96   : > { %v355_v23 = vpop.permute.xlu0 %354 }
  0x98   : > { %v1293_v39 = vpop.permute.xlu1 %367 }
  0x9a   : > { %v1289_v33 = vpop.permute.xlu0 %372 }
  0x9c   : > { %v1314_v49 = vpop.permute.xlu1 %379 }
  0x9e   : > { %v1317_v53 = vpop.permute.xlu0 %384 }
  0xf5   : > { %v446_v20 = vpop.f32.mrb[0].mxu0 }
  0xf6   : > { %v447_v21 = vadd.f32 %v446_v20, %v350_v19  ;;  %v961_v22 = vpop.f32.mrb[1].mxu0 }
  0xf7   : > { %v449_v24 = vpop.f32.mrb[2].mxu0 }
  0xf8   : > { %v450_v25 = vadd.f32 %v449_v24, %v355_v23  ;;  %v962_v26 = vpop.f32.mrb[3].mxu0  ;;  %v453_v27 = vmax.f32 %v447_v21, 0.0 }
  0xfa   : > { %v454_v28 = vmax.f32 %v450_v25, 0.0 }
  0xfc   : > { %v455_v29 = vpack.c.bf16 %v454_v28, %v453_v27 }
  0xfe   : > { %1009 = vmatprep.subr.msk.bf16.mxu1 %vm471_vm4, %v455_v29  ;;  %v473_v30 = vsel %vm471_vm4, %v455_v29, 0 }
  0xff   : > { %964 = vmatpush3.bf16.msra.mxu1 %v473_v30 }
 0x100   : > { %977 = vmatprep.subr.bf16.mxu1 %v1123_v1 }
 0x102   : > { %966 = vmatmul.mubr.msk.bf16.vlgmr.msra.gmra.mrb[0].mxu1 %vm464_vm3, %v1280_v31 }
 0x103   : > { %979 = vmatprep.mubr.msk.bf16.mxu1 %vm1124_vm0, %v1123_v1 }
 0x1d5   : > { %v967_v34 = vpop.f32.mrb[0].mxu1 }
 0x1d6   : > { %v518_v35 = vadd.f32 %v967_v34, %v1289_v33  ;;  %v509_v36 = vpop.f32.mrb[1].mxu1 }
 0x1d7   : > { %v510_v37 = vadd.f32 %v509_v36, %v1287_v32  ;;  %v968_v38 = vpop.f32.mrb[2].mxu1 }
 0x1d8   : > { %v512_v40 = vpop.f32.mrb[3].mxu1  ;;  %v525_v42 = vmax.f32 %v518_v35, 0.0 }
 0x1d9   : > { %v513_v41 = vadd.f32 %v512_v40, %v1293_v39  ;;  %v523_v43 = vmax.f32 %v510_v37, 0.0 }
 0x1da   : > { %v527_v46 = vpack.c.bf16 %v525_v42, %v525_v42 }
 0x1db   : > { %v524_v44 = vmax.f32 %v513_v41, 0.0 }
 0x1dc   : > { %v539_v47 = vsel %vm537_vm5, %v527_v46, 0 }
 0x1dd   : > { %v526_v45 = vpack.c.bf16 %v524_v44, %v523_v43 }
 0x1df   : > { %970 = vmatpush3.bf16.msra.mxu0 %v526_v45 }
 0x1e0   : > { %971 = vmatprep.subr.bf16.mxu0 %v1123_v1 }
 0x1e3   : > { %972 = vmatpush3.bf16.msra.mxu0 %v539_v47 }
 0x1e4   : > { %983 = vmatprep.subr.bf16.mxu0 %v1123_v1 }
 0x1e6   : > { %974 = vmatmul.mubr.msk.bf16.vlgmr.msra.gmra.mrb[4].mxu0 %vm533_vm6, %v1301_v48 }
 0x1e7   : > { %984 = vmatpush3.bf16.msra.mxu0 %v1244_v11  ;;  %985 = vmatprep.mubr.msk.bf16.mxu0 %vm1124_vm0, %v1123_v1  ;;  %v395_v11 = vsub.s32 0, %v394_v10 }
 0x1e8   : > { %995 = vmatprep.subr.bf16.mxu0 %v1123_v1 }
 0x1ee   : > { %986 = vmatmul.mubr.msk.bf16.vlgmr.msra.gmra.mrb[8].mxu0 %vm404_vm2, %v1249_v12  ;;  %v391_v12 = vpop.permute.xlu1 %390 }
 0x1ef   : > { %999 = vmatprep.mubr.msk.bf16.mxu0 %vm1124_vm0, %v1123_v1  ;;  %v396_v13 = vrot.slane %v391_v12, %v395_v11 }
 0x2b9   : > { %v575_v50 = vpop.f32.mrb[4].mxu0 }
 0x2ba   : > { %v576_v51 = vadd.f32 %v575_v50, %v1314_v49  ;;  %v975_v52 = vpop.f32.mrb[5].mxu0 }
 0x2bb   : > { %v578_v54 = vpop.f32.mrb[6].mxu0 }
 0x2bc   : > { %v579_v55 = vadd.f32 %v578_v54, %v1317_v53  ;;  %v976_v56 = vpop.f32.mrb[7].mxu0  ;;  %v582_v57 = vmax.f32 %v576_v51, 0.0 }
 0x2be   : > { %v583_v58 = vmax.f32 %v579_v55, 0.0 }
 0x2c0   : > { %v584_v59 = vpack.c.bf16 %v583_v58, %v582_v57 }
 0x2c1   : > { %v676_v60 = vpop.f32.mrb[8].mxu0 }
 0x2c2   : > { %v677_v61 = vadd.f32 %v676_v60, %v350_v19  ;;  %v987_v62 = vpop.f32.mrb[9].mxu0  ;;  %v589_v63 = vsel %vm471_vm4, %v584_v59, 0 }
 0x2c3   : > { %978 = vmatpush3.bf16.msra.mxu1 %v589_v63  ;;  %v679_v0 = vpop.f32.mrb[10].mxu0 }
 0x2c4   : > { %v680_v3 = vadd.f32 %v679_v0, %v355_v23  ;;  %v988_v4 = vpop.f32.mrb[11].mxu0  ;;  %v683_v5 = vmax.f32 %v677_v61, 0.0 }
 0x2c6   : > { %v684_v6 = vmax.f32 %v680_v3, 0.0  ;;  %980 = vmatmul.mubr.msk.bf16.vlgmr.msra.gmra.mrb[4].mxu1 %vm464_vm3, %v344_v2 }
 0x2c7   : > { %991 = vmatprep.mubr.msk.bf16.mxu1 %vm464_vm3, %v1262_v14 }
 0x2c8   : > { %v685_v7 = vpack.c.bf16 %v684_v6, %v683_v5 }
 0x2ca   : > { %1010 = vmatprep.subr.msk.bf16.mxu1 %vm471_vm4, %v685_v7  ;;  %v687_v8 = vsel %vm471_vm4, %v685_v7, 0 }
 0x2cb   : > { %990 = vmatpush3.bf16.msra.mxu1 %v687_v8 }
 0x2cc   : > { %1003 = vmatprep.subr.bf16.mxu1 %v1123_v1 }
 0x2ce   : > { %992 = vmatmul.mubr.msk.bf16.vlgmr.msra.gmra.mrb[8].mxu1 %vm464_vm3, %v1280_v31 }
 0x2cf   : > { %1005 = vmatprep.mubr.msk.bf16.mxu1 %vm1124_vm0, %v1123_v1 }
 0x399   : > { %v625_v15 = vpop.f32.mrb[4].mxu1 }
 0x39a   : > { %v626_v16 = vadd.f32 %v625_v15, %v396_v13  ;;  %v981_v17 = vpop.f32.mrb[5].mxu1 }
 0x39b   : > { %v628_v18 = vpop.f32.mrb[6].mxu1 }
 0x39c   : > { %635 = vst.msk [vmem:[%s1341_s27] sm:$0x1] %vm1337_vm7, %v626_v16  ;;  %v982_v19 = vpop.f32.mrb[7].mxu1 }
 0x3a1   : > { %v993_v20 = vpop.f32.mrb[8].mxu1 }
 0x3a2   : > { %v732_v21 = vadd.f32 %v993_v20, %v1289_v33  ;;  %v723_v22 = vpop.f32.mrb[9].mxu1 }
 0x3a3   : > { %v724_v23 = vadd.f32 %v723_v22, %v1287_v32  ;;  %v994_v24 = vpop.f32.mrb[10].mxu1 }
 0x3a4   : > { %v726_v25 = vpop.f32.mrb[11].mxu1  ;;  %v739_v27 = vmax.f32 %v732_v21, 0.0 }
 0x3a5   : > { %v727_v26 = vadd.f32 %v726_v25, %v1293_v39  ;;  %v737_v28 = vmax.f32 %v724_v23, 0.0 }
 0x3a6   : > { %v741_v31 = vpack.c.bf16 %v739_v27, %v739_v27 }
 0x3a7   : > { %v738_v29 = vmax.f32 %v727_v26, 0.0 }
 0x3a8   : > { %v743_v34 = vsel %vm537_vm5, %v741_v31, 0 }
 0x3a9   : > { %v740_v30 = vpack.c.bf16 %v738_v29, %v737_v28 }
 0x3ab   : > { %996 = vmatpush3.bf16.msra.mxu0 %v740_v30 }
 0x3ac   : > { %997 = vmatprep.subr.bf16.mxu0 %v1123_v1 }
 0x3af   : > { %998 = vmatpush3.bf16.msra.mxu0 %v743_v34 }
 0x3b2   : > { %1000 = vmatmul.mubr.msk.bf16.vlgmr.msra.gmra.mrb[12].mxu0 %vm533_vm6, %v1301_v48 }
 0x485   : > { %v779_v32 = vpop.f32.mrb[12].mxu0 }
 0x486   : > { %v780_v33 = vadd.f32 %v779_v32, %v1314_v49  ;;  %v1001_v35 = vpop.f32.mrb[13].mxu0 }
 0x487   : > { %v782_v36 = vpop.f32.mrb[14].mxu0 }
 0x488   : > { %v783_v37 = vadd.f32 %v782_v36, %v1317_v53  ;;  %v1002_v38 = vpop.f32.mrb[15].mxu0  ;;  %v786_v39 = vmax.f32 %v780_v33, 0.0 }
 0x48a   : > { %v787_v1 = vmax.f32 %v783_v37, 0.0 }
 0x48c   : > { %v788_v40 = vpack.c.bf16 %v787_v1, %v786_v39 }
 0x48e   : > { %v790_v41 = vsel %vm471_vm4, %v788_v40, 0 }
 0x48f   : > { %1004 = vmatpush3.bf16.msra.mxu1 %v790_v41 }
 0x492   : > { %1006 = vmatmul.mubr.msk.bf16.vlgmr.msra.gmra.mrb[12].mxu1 %vm464_vm3, %v344_v2 }
 0x565   : > { %v826_v42 = vpop.f32.mrb[12].mxu1 }
 0x566   : > { %v827_v43 = vadd.f32 %v826_v42, %v396_v13  ;;  %v1007_v44 = vpop.f32.mrb[13].mxu1 }
 0x567   : > { %v829_v45 = vpop.f32.mrb[14].mxu1 }
 0x568   : > { %930 = vst.msk [vmem:[%s1341_s27 + $0x1] sm:$0x1] %vm1337_vm7, %v827_v43  ;;  %v1008_v46 = vpop.f32.mrb[15].mxu1 }
 0x569   : > { %1072 = shalt.err (!%p1069_p3)
}
 0x56a   : > { %s1073_s24 = scalar_lea.hbm %s1362_s15, 32  ;;  %s1077_s27 = scalar_lea.hbm %s1418_s9, 64 }
 0x56b   : > { %p1074_p4 = scmp.ne.s32.totalorder %s1362_s15, %s1073_s24  ;;  %p1078_p9 = scmp.lt.u32.totalorder %s1362_s15, %s1418_s9 }
 0x56c   : > { %p1079_p10 = scmp.lt.u32.totalorder %s1077_s27, %s1073_s24  ;;  %p1081_p12 = scmp.lt.u32.totalorder %s1073_s24, %s1362_s15 }
 0x56d   : > { %p1075_p7 = pnand %p1074_p4, %p1218_p5 }
 0x56e   : > { %p1080_p11 = por %p1079_p10, %p1078_p9 }
 0x56f   : > { %p1076_p8 = pneg %p1075_p7 }
 0x570   : > { %p1082_p13 = por %p1081_p12, %p1080_p11 }
 0x572   : > { %p1083_p0 = pnand %p1082_p13, %p1076_p8 }
 0x574   : > { %1086 = shalt.err (!%p1083_p0)
}
 0x575   : > { %1011 = dma.vmem_to_hbm [thread:$0]  (%p1218_p5), %s1364_s29, 32, %s1362_s15, %s835_s8  }
 0x576 PF: > { %p1017_p1 = scmp.ge.s32.totalorder %s1121_s14, 2  ;;  %s861_s10 = sand.u32 1, %s1109_s11  }
 0x577   : > { %s862_s17 = scalar_lea.sflag [#allocation4], %s861_s10 }
 0x578   : > { %p1014_p2 = pnand %p1017_p1, %p1222_p6 }
 0x57a   : > { %1104 = dma.done.wait (!%p1014_p2), %s862_s17, 32  }
 0x57b   : > { %1106 = vsyncadd (!%p1014_p2), %s862_s17, 4294967264  ;;  %p21_p3 = scmp.ge.s32.totalorder %s1205_s16, 4   ;;  %s1423_s11 = smov %s1113_s12 }
 0x57c   : > { %s1424_s12 = smov %s1117_s13  ;;  %s1425_s13 = smov %s1216_s19 }
 0x57d   : > { %s1426_s14 = smov %s1205_s16  ;;  %23 = sbr.rel (!%p21_p3) target bundleno = 6 (0x6), region = 93 }
 0x584   :  { %867 = vsyncpa [#allocation4], 1 }
 0x585   :  { %869 = vsyncpa [#allocation4 + $0x1], 1 }

</bundles_post_ra>
